<compile_context>
chip_gen: v6e
topology: v6e:2x2x1
jax: 0.10.0
libtpu: 0.0.40
codegen_flags: <defaults>
</compile_context>

<pallas_src>
import jax
import jax.numpy as jnp
from jax.experimental import pallas as pl
from jax.experimental.pallas import tpu as pltpu


def lstm_tagger_kernel(x_ref, w_ih_ref, w_hh_ref, b_ref, w_out_ref, b_out_ref,
                       out_ref, h_all_scr):
    """Single-invocation LSTM tagger.

    x_ref:      (B*S, D)   flattened input sequence (batch-major row order)
    w_ih_ref:   (D, 4H)    input-to-hidden weights (pre-transposed; gates i,f,g,o)
    w_hh_ref:   (H, 4H)    hidden-to-hidden weights (pre-transposed)
    b_ref:      (1, 4H)    combined bias b_ih + b_hh
    w_out_ref:  (H, T)     hidden2tag weight (pre-transposed)
    b_out_ref:  (1, T)     hidden2tag bias
    out_ref:    (B*S, T)   log-softmax tag scores (wrapper reshapes to (B,S,T))
    h_all_scr:  (B, S, H)  VMEM scratch: all hidden states for the batched head
    """
    B, S, H = h_all_scr.shape

    # ---- Phase 1 [R1]: hoisted input projection, single MXU matmul ---------
    # (B*S, D) @ (D, 4H) + b  — kept as a value (no VMEM round-trip).
    xw = jnp.dot(x_ref[...], w_ih_ref[...],
                 preferred_element_type=jnp.float32) + b_ref[...]
    xw = xw.reshape(B, S, 4 * H)     # layout-preserving: (8,128)-tiled trailing dims

    w_hh = w_hh_ref[...]

    # ---- Phase 2: time recurrence (serial, fully unrolled static loop) -----
    # Only h @ W_hh + gate math remain on the serial chain.
    h = jnp.zeros((B, H), jnp.float32)
    c = jnp.zeros((B, H), jnp.float32)
    for t in range(S):                                    # [R8] unrolled (S small)
        gates = xw[:, t, :] + jnp.dot(h, w_hh,
                                      preferred_element_type=jnp.float32)
        # [R3] full-width activations: 2 EUP pushes over the (B, 4H) vreg.
        sig = jax.nn.sigmoid(gates)
        th = jnp.tanh(gates)
        i_g = sig[:, 0 * H:1 * H]
        f_g = sig[:, 1 * H:2 * H]
        g_g = th[:, 2 * H:3 * H]
        o_g = sig[:, 3 * H:4 * H]
        c = f_g * c + i_g * g_g
        h = o_g * jnp.tanh(c)
        # [R4] not on the h->h dependency chain; overlapped by the scheduler.
        h_all_scr[:, t, :] = h

    # ---- Phase 3 [R2]: hoisted tag head + log_softmax, one pass ------------
    h_flat = h_all_scr[...].reshape(B * S, H)             # layout-preserving collapse
    tag = jnp.dot(h_flat, w_out_ref[...],
                  preferred_element_type=jnp.float32) + b_out_ref[...]   # (B*S, T)
    m = jnp.max(tag, axis=-1, keepdims=True)
    lse = m + jnp.log(jnp.sum(jnp.exp(tag - m), axis=-1, keepdims=True))
    out_ref[...] = (tag - lse).astype(out_ref.dtype)       # single dense store


def prepare_params(w_ih, w_hh, b_ih, b_hh, w_out, b_out):
    """[R5] One-time (init-time) weight preparation — not on the call path."""
    H4 = w_ih.shape[0]
    T = w_out.shape[0]
    return (jnp.transpose(w_ih),                  # (D, 4H)
            jnp.transpose(w_hh),                  # (H, 4H)
            (b_ih + b_hh).reshape(1, H4),         # (1, 4H)
            jnp.transpose(w_out),                 # (H, T)
            b_out.reshape(1, T))                  # (1, T)


def lstm_tagger_pallas(x, params):
    """x: (B, S, D) float32.  params from prepare_params().  Returns (B,S,T)."""
    w_ih_t, w_hh_t, b, w_out_t, b_out2 = params
    B, S, D = x.shape
    H = w_hh_t.shape[0]
    T = w_out_t.shape[1]

    # [R1] free metadata reshape (contiguous), no HBM pass / transpose.
    x2 = x.reshape(B * S, D)

    out2 = pl.pallas_call(
        lstm_tagger_kernel,
        out_shape=jax.ShapeDtypeStruct((B * S, T), x.dtype),
        grid_spec=pltpu.PrefetchScalarGridSpec(
            num_scalar_prefetch=0,
            grid=(1,),                      # single invocation: no per-step grid overhead
            in_specs=[
                pl.BlockSpec((B * S, D), lambda i: (0, 0)),
                pl.BlockSpec((D, 4 * H), lambda i: (0, 0)),
                pl.BlockSpec((H, 4 * H), lambda i: (0, 0)),
                pl.BlockSpec((1, 4 * H), lambda i: (0, 0)),
                pl.BlockSpec((H, T), lambda i: (0, 0)),
                pl.BlockSpec((1, T), lambda i: (0, 0)),
            ],
            out_specs=pl.BlockSpec((B * S, T), lambda i: (0, 0)),
            scratch_shapes=[
                pltpu.VMEM((B, S, H), jnp.float32),   # all hidden states
            ],
        ),
        compiler_params=pltpu.CompilerParams(
            dimension_semantics=("arbitrary",)),
    )(x2, w_ih_t, w_hh_t, b, w_out_t, b_out2)

    # [R2] free metadata reshape back to (B, S, T).
    return out2.reshape(B, S, T)


def lstm_tagger_reference(x, w_ih, w_hh, b_ih, b_hh, w_out, b_out):
    """Pure-JAX reference matching torch.nn.LSTM(batch_first=True) semantics."""
    B, S, D = x.shape
    H = w_hh.shape[1]

    def step(carry, x_t):
        h, c = carry
        gates = x_t @ w_ih.T + b_ih + h @ w_hh.T + b_hh
        i_g = jax.nn.sigmoid(gates[:, 0 * H:1 * H])
        f_g = jax.nn.sigmoid(gates[:, 1 * H:2 * H])
        g_g = jnp.tanh(gates[:, 2 * H:3 * H])
        o_g = jax.nn.sigmoid(gates[:, 3 * H:4 * H])
        c_new = f_g * c + i_g * g_g
        h_new = o_g * jnp.tanh(c_new)
        return (h_new, c_new), h_new

    h0 = jnp.zeros((B, H), jnp.float32)
    c0 = jnp.zeros((B, H), jnp.float32)
    _, hs = jax.lax.scan(step, (h0, c0), jnp.transpose(x, (1, 0, 2)))
    lstm_out = jnp.transpose(hs, (1, 0, 2))            # (B, S, H)
    tag = lstm_out @ w_out.T + b_out                   # (B, S, T)
    return jax.nn.log_softmax(tag, axis=2)


if __name__ == "__main__":
    # Small shapes consistent with the module's forward:
    # column: (batch, seq, input_dim); LSTM hidden_dim; Linear -> target_size
    B, S, D, H, T = 2, 8, 16, 32, 8

    key = jax.random.PRNGKey(0)
    ks = jax.random.split(key, 7)
    k_init = 1.0 / jnp.sqrt(jnp.float32(H))   # PyTorch-style uniform init bound

    x = jax.random.normal(ks[0], (B, S, D), jnp.float32)
    w_ih = jax.random.uniform(ks[1], (4 * H, D), jnp.float32, -k_init, k_init)
    w_hh = jax.random.uniform(ks[2], (4 * H, H), jnp.float32, -k_init, k_init)
    b_ih = jax.random.uniform(ks[3], (4 * H,), jnp.float32, -k_init, k_init)
    b_hh = jax.random.uniform(ks[4], (4 * H,), jnp.float32, -k_init, k_init)
    w_out = jax.random.uniform(ks[5], (T, H), jnp.float32, -k_init, k_init)
    b_out = jax.random.uniform(ks[6], (T,), jnp.float32, -k_init, k_init)

    # [R5] one-time weight prep (init-time), not on the per-call path.
    params = prepare_params(w_ih, w_hh, b_ih, b_hh, w_out, b_out)
    params = jax.tree_util.tree_map(jax.block_until_ready, params)

    out = lstm_tagger_pallas(x, params)
    out = jax.block_until_ready(out)

    ref = lstm_tagger_reference(x, w_ih, w_hh, b_ih, b_hh, w_out, b_out)
    assert out.shape == (B, S, T), out.shape
    assert jnp.allclose(out, ref, atol=1e-4, rtol=1e-4), \
        float(jnp.max(jnp.abs(out - ref)))

    print("KERNEL_OK")
</pallas_src>

<mosaic_0001>
module attributes {stable_mosaic.version = 11 : i64} {
  func.func @lstm_tagger_kernel(%arg0: i32, %arg1: memref<16x16xf32, #tpu.memory_space<vmem>>, %arg2: memref<16x128xf32, #tpu.memory_space<vmem>>, %arg3: memref<32x128xf32, #tpu.memory_space<vmem>>, %arg4: memref<1x128xf32, #tpu.memory_space<vmem>>, %arg5: memref<32x8xf32, #tpu.memory_space<vmem>>, %arg6: memref<1x8xf32, #tpu.memory_space<vmem>>, %arg7: memref<16x8xf32, #tpu.memory_space<vmem>>, %arg8: memref<2x8x32xf32, #tpu.memory_space<vmem>>) attributes {dimension_semantics = [#tpu.dimension_semantics<arbitrary>], iteration_bounds = array<i64: 1>, scalar_prefetch = 0 : i64, scratch_operands = 1 : i64, tpu.core_type = #tpu.core_type<tc>, window_params = [{pipeline_mode = #tpu.pipeline_mode<synchronous>, transform_indices = @transform_0, window_bounds = array<i64: 16, 16>}, {pipeline_mode = #tpu.pipeline_mode<synchronous>, transform_indices = @transform_1, window_bounds = array<i64: 16, 128>}, {pipeline_mode = #tpu.pipeline_mode<synchronous>, transform_indices = @transform_2, window_bounds = array<i64: 32, 128>}, {pipeline_mode = #tpu.pipeline_mode<synchronous>, transform_indices = @transform_3, window_bounds = array<i64: 1, 128>}, {pipeline_mode = #tpu.pipeline_mode<synchronous>, transform_indices = @transform_4, window_bounds = array<i64: 32, 8>}, {pipeline_mode = #tpu.pipeline_mode<synchronous>, transform_indices = @transform_5, window_bounds = array<i64: 1, 8>}, {pipeline_mode = #tpu.pipeline_mode<synchronous>, transform_indices = @transform_6, window_bounds = array<i64: 16, 8>}]} {
    %c0 = arith.constant 0 : index
    %c0_0 = arith.constant 0 : index
    %0 = vector.load %arg1[%c0, %c0_0] : memref<16x16xf32, #tpu.memory_space<vmem>>, vector<16x16xf32>
    %c0_1 = arith.constant 0 : index
    %c0_2 = arith.constant 0 : index
    %1 = vector.load %arg2[%c0_1, %c0_2] : memref<16x128xf32, #tpu.memory_space<vmem>>, vector<16x128xf32>
    %cst = arith.constant dense<0.000000e+00> : vector<16x128xf32>
    %2 = tpu.matmul %0, %1, %cst {dimension_numbers = #tpu.dot_dimension_numbers<[1], [0], [0], [1], [0, 0, 1, 1], [], []>} : vector<16x16xf32>, vector<16x128xf32>, vector<16x128xf32> -> vector<16x128xf32>
    %c0_3 = arith.constant 0 : index
    %c0_4 = arith.constant 0 : index
    %3 = vector.load %arg4[%c0_3, %c0_4] : memref<1x128xf32, #tpu.memory_space<vmem>>, vector<1x128xf32>
    %4 = vector.broadcast %3 : vector<1x128xf32> to vector<16x128xf32>
    %5 = arith.addf %2, %4 : vector<16x128xf32>
    %6 = vector.shape_cast %5 : vector<16x128xf32> to vector<2x8x128xf32>
    %c0_5 = arith.constant 0 : index
    %c0_6 = arith.constant 0 : index
    %7 = vector.load %arg3[%c0_5, %c0_6] : memref<32x128xf32, #tpu.memory_space<vmem>>, vector<32x128xf32>
    %cst_7 = arith.constant 0.000000e+00 : f32
    %8 = vector.broadcast %cst_7 : f32 to vector<2x32xf32>
    %cst_8 = arith.constant 0.000000e+00 : f32
    %9 = vector.broadcast %cst_8 : f32 to vector<2x32xf32>
    %10 = vector.extract_strided_slice %6 {offsets = [0, 0, 0], sizes = [2, 1, 128], strides = [1, 1, 1]} : vector<2x8x128xf32> to vector<2x1x128xf32>
    %11 = vector.shape_cast %10 : vector<2x1x128xf32> to vector<2x128xf32>
    %cst_9 = arith.constant dense<0.000000e+00> : vector<2x128xf32>
    %12 = tpu.matmul %8, %7, %cst_9 {dimension_numbers = #tpu.dot_dimension_numbers<[1], [0], [0], [1], [0, 0, 1, 1], [], []>} : vector<2x32xf32>, vector<32x128xf32>, vector<2x128xf32> -> vector<2x128xf32>
    %13 = arith.addf %11, %12 : vector<2x128xf32>
    %14 = arith.negf %13 : vector<2x128xf32>
    %15 = math.exp %14 : vector<2x128xf32>
    %cst_10 = arith.constant 1.000000e+00 : f32
    %16 = vector.broadcast %cst_10 : f32 to vector<2x128xf32>
    %17 = arith.addf %16, %15 : vector<2x128xf32>
    %18 = arith.divf %16, %17 : vector<2x128xf32>
    %19 = math.tanh %13 : vector<2x128xf32>
    %20 = vector.extract_strided_slice %18 {offsets = [0, 0], sizes = [2, 32], strides = [1, 1]} : vector<2x128xf32> to vector<2x32xf32>
    %21 = vector.extract_strided_slice %18 {offsets = [0, 32], sizes = [2, 32], strides = [1, 1]} : vector<2x128xf32> to vector<2x32xf32>
    %22 = vector.extract_strided_slice %19 {offsets = [0, 64], sizes = [2, 32], strides = [1, 1]} : vector<2x128xf32> to vector<2x32xf32>
    %23 = vector.extract_strided_slice %18 {offsets = [0, 96], sizes = [2, 32], strides = [1, 1]} : vector<2x128xf32> to vector<2x32xf32>
    %24 = arith.mulf %21, %9 : vector<2x32xf32>
    %25 = arith.mulf %20, %22 : vector<2x32xf32>
    %26 = arith.addf %24, %25 : vector<2x32xf32>
    %27 = math.tanh %26 : vector<2x32xf32>
    %28 = arith.mulf %23, %27 : vector<2x32xf32>
    %c0_11 = arith.constant 0 : index
    %c0_12 = arith.constant 0 : index
    %c0_13 = arith.constant 0 : index
    %29 = vector.load %arg8[%c0_11, %c0_12, %c0_13] : memref<2x8x32xf32, #tpu.memory_space<vmem>>, vector<2x1x32xf32>
    %30 = vector.shape_cast %29 : vector<2x1x32xf32> to vector<2x32xf32>
    %31 = vector.shape_cast %28 : vector<2x32xf32> to vector<2x1x32xf32>
    tpu.vector_store %arg8[%c0_11, %c0_12, %c0_13], %31 {strides = array<i32>} : memref<2x8x32xf32, #tpu.memory_space<vmem>>, vector<2x1x32xf32>,
    %32 = vector.extract_strided_slice %6 {offsets = [0, 1, 0], sizes = [2, 1, 128], strides = [1, 1, 1]} : vector<2x8x128xf32> to vector<2x1x128xf32>
    %33 = vector.shape_cast %32 : vector<2x1x128xf32> to vector<2x128xf32>
    %cst_14 = arith.constant dense<0.000000e+00> : vector<2x128xf32>
    %34 = tpu.matmul %28, %7, %cst_14 {dimension_numbers = #tpu.dot_dimension_numbers<[1], [0], [0], [1], [0, 0, 1, 1], [], []>} : vector<2x32xf32>, vector<32x128xf32>, vector<2x128xf32> -> vector<2x128xf32>
    %35 = arith.addf %33, %34 : vector<2x128xf32>
    %36 = arith.negf %35 : vector<2x128xf32>
    %37 = math.exp %36 : vector<2x128xf32>
    %cst_15 = arith.constant 1.000000e+00 : f32
    %38 = vector.broadcast %cst_15 : f32 to vector<2x128xf32>
    %39 = arith.addf %38, %37 : vector<2x128xf32>
    %40 = arith.divf %38, %39 : vector<2x128xf32>
    %41 = math.tanh %35 : vector<2x128xf32>
    %42 = vector.extract_strided_slice %40 {offsets = [0, 0], sizes = [2, 32], strides = [1, 1]} : vector<2x128xf32> to vector<2x32xf32>
    %43 = vector.extract_strided_slice %40 {offsets = [0, 32], sizes = [2, 32], strides = [1, 1]} : vector<2x128xf32> to vector<2x32xf32>
    %44 = vector.extract_strided_slice %41 {offsets = [0, 64], sizes = [2, 32], strides = [1, 1]} : vector<2x128xf32> to vector<2x32xf32>
    %45 = vector.extract_strided_slice %40 {offsets = [0, 96], sizes = [2, 32], strides = [1, 1]} : vector<2x128xf32> to vector<2x32xf32>
    %46 = arith.mulf %43, %26 : vector<2x32xf32>
    %47 = arith.mulf %42, %44 : vector<2x32xf32>
    %48 = arith.addf %46, %47 : vector<2x32xf32>
    %49 = math.tanh %48 : vector<2x32xf32>
    %50 = arith.mulf %45, %49 : vector<2x32xf32>
    %c0_16 = arith.constant 0 : index
    %c1 = arith.constant 1 : index
    %c0_17 = arith.constant 0 : index
    %51 = vector.load %arg8[%c0_16, %c1, %c0_17] : memref<2x8x32xf32, #tpu.memory_space<vmem>>, vector<2x1x32xf32>
    %52 = vector.shape_cast %51 : vector<2x1x32xf32> to vector<2x32xf32>
    %53 = vector.shape_cast %50 : vector<2x32xf32> to vector<2x1x32xf32>
    tpu.vector_store %arg8[%c0_16, %c1, %c0_17], %53 {strides = array<i32>} : memref<2x8x32xf32, #tpu.memory_space<vmem>>, vector<2x1x32xf32>,
    %54 = vector.extract_strided_slice %6 {offsets = [0, 2, 0], sizes = [2, 1, 128], strides = [1, 1, 1]} : vector<2x8x128xf32> to vector<2x1x128xf32>
    %55 = vector.shape_cast %54 : vector<2x1x128xf32> to vector<2x128xf32>
    %cst_18 = arith.constant dense<0.000000e+00> : vector<2x128xf32>
    %56 = tpu.matmul %50, %7, %cst_18 {dimension_numbers = #tpu.dot_dimension_numbers<[1], [0], [0], [1], [0, 0, 1, 1], [], []>} : vector<2x32xf32>, vector<32x128xf32>, vector<2x128xf32> -> vector<2x128xf32>
    %57 = arith.addf %55, %56 : vector<2x128xf32>
    %58 = arith.negf %57 : vector<2x128xf32>
    %59 = math.exp %58 : vector<2x128xf32>
    %cst_19 = arith.constant 1.000000e+00 : f32
    %60 = vector.broadcast %cst_19 : f32 to vector<2x128xf32>
    %61 = arith.addf %60, %59 : vector<2x128xf32>
    %62 = arith.divf %60, %61 : vector<2x128xf32>
    %63 = math.tanh %57 : vector<2x128xf32>
    %64 = vector.extract_strided_slice %62 {offsets = [0, 0], sizes = [2, 32], strides = [1, 1]} : vector<2x128xf32> to vector<2x32xf32>
    %65 = vector.extract_strided_slice %62 {offsets = [0, 32], sizes = [2, 32], strides = [1, 1]} : vector<2x128xf32> to vector<2x32xf32>
    %66 = vector.extract_strided_slice %63 {offsets = [0, 64], sizes = [2, 32], strides = [1, 1]} : vector<2x128xf32> to vector<2x32xf32>
    %67 = vector.extract_strided_slice %62 {offsets = [0, 96], sizes = [2, 32], strides = [1, 1]} : vector<2x128xf32> to vector<2x32xf32>
    %68 = arith.mulf %65, %48 : vector<2x32xf32>
    %69 = arith.mulf %64, %66 : vector<2x32xf32>
    %70 = arith.addf %68, %69 : vector<2x32xf32>
    %71 = math.tanh %70 : vector<2x32xf32>
    %72 = arith.mulf %67, %71 : vector<2x32xf32>
    %c0_20 = arith.constant 0 : index
    %c2 = arith.constant 2 : index
    %c0_21 = arith.constant 0 : index
    %73 = vector.load %arg8[%c0_20, %c2, %c0_21] : memref<2x8x32xf32, #tpu.memory_space<vmem>>, vector<2x1x32xf32>
    %74 = vector.shape_cast %73 : vector<2x1x32xf32> to vector<2x32xf32>
    %75 = vector.shape_cast %72 : vector<2x32xf32> to vector<2x1x32xf32>
    tpu.vector_store %arg8[%c0_20, %c2, %c0_21], %75 {strides = array<i32>} : memref<2x8x32xf32, #tpu.memory_space<vmem>>, vector<2x1x32xf32>,
    %76 = vector.extract_strided_slice %6 {offsets = [0, 3, 0], sizes = [2, 1, 128], strides = [1, 1, 1]} : vector<2x8x128xf32> to vector<2x1x128xf32>
    %77 = vector.shape_cast %76 : vector<2x1x128xf32> to vector<2x128xf32>
    %cst_22 = arith.constant dense<0.000000e+00> : vector<2x128xf32>
    %78 = tpu.matmul %72, %7, %cst_22 {dimension_numbers = #tpu.dot_dimension_numbers<[1], [0], [0], [1], [0, 0, 1, 1], [], []>} : vector<2x32xf32>, vector<32x128xf32>, vector<2x128xf32> -> vector<2x128xf32>
    %79 = arith.addf %77, %78 : vector<2x128xf32>
    %80 = arith.negf %79 : vector<2x128xf32>
    %81 = math.exp %80 : vector<2x128xf32>
    %cst_23 = arith.constant 1.000000e+00 : f32
    %82 = vector.broadcast %cst_23 : f32 to vector<2x128xf32>
    %83 = arith.addf %82, %81 : vector<2x128xf32>
    %84 = arith.divf %82, %83 : vector<2x128xf32>
    %85 = math.tanh %79 : vector<2x128xf32>
    %86 = vector.extract_strided_slice %84 {offsets = [0, 0], sizes = [2, 32], strides = [1, 1]} : vector<2x128xf32> to vector<2x32xf32>
    %87 = vector.extract_strided_slice %84 {offsets = [0, 32], sizes = [2, 32], strides = [1, 1]} : vector<2x128xf32> to vector<2x32xf32>
    %88 = vector.extract_strided_slice %85 {offsets = [0, 64], sizes = [2, 32], strides = [1, 1]} : vector<2x128xf32> to vector<2x32xf32>
    %89 = vector.extract_strided_slice %84 {offsets = [0, 96], sizes = [2, 32], strides = [1, 1]} : vector<2x128xf32> to vector<2x32xf32>
    %90 = arith.mulf %87, %70 : vector<2x32xf32>
    %91 = arith.mulf %86, %88 : vector<2x32xf32>
    %92 = arith.addf %90, %91 : vector<2x32xf32>
    %93 = math.tanh %92 : vector<2x32xf32>
    %94 = arith.mulf %89, %93 : vector<2x32xf32>
    %c0_24 = arith.constant 0 : index
    %c3 = arith.constant 3 : index
    %c0_25 = arith.constant 0 : index
    %95 = vector.load %arg8[%c0_24, %c3, %c0_25] : memref<2x8x32xf32, #tpu.memory_space<vmem>>, vector<2x1x32xf32>
    %96 = vector.shape_cast %95 : vector<2x1x32xf32> to vector<2x32xf32>
    %97 = vector.shape_cast %94 : vector<2x32xf32> to vector<2x1x32xf32>
    tpu.vector_store %arg8[%c0_24, %c3, %c0_25], %97 {strides = array<i32>} : memref<2x8x32xf32, #tpu.memory_space<vmem>>, vector<2x1x32xf32>,
    %98 = vector.extract_strided_slice %6 {offsets = [0, 4, 0], sizes = [2, 1, 128], strides = [1, 1, 1]} : vector<2x8x128xf32> to vector<2x1x128xf32>
    %99 = vector.shape_cast %98 : vector<2x1x128xf32> to vector<2x128xf32>
    %cst_26 = arith.constant dense<0.000000e+00> : vector<2x128xf32>
    %100 = tpu.matmul %94, %7, %cst_26 {dimension_numbers = #tpu.dot_dimension_numbers<[1], [0], [0], [1], [0, 0, 1, 1], [], []>} : vector<2x32xf32>, vector<32x128xf32>, vector<2x128xf32> -> vector<2x128xf32>
    %101 = arith.addf %99, %100 : vector<2x128xf32>
    %102 = arith.negf %101 : vector<2x128xf32>
    %103 = math.exp %102 : vector<2x128xf32>
    %cst_27 = arith.constant 1.000000e+00 : f32
    %104 = vector.broadcast %cst_27 : f32 to vector<2x128xf32>
    %105 = arith.addf %104, %103 : vector<2x128xf32>
    %106 = arith.divf %104, %105 : vector<2x128xf32>
    %107 = math.tanh %101 : vector<2x128xf32>
    %108 = vector.extract_strided_slice %106 {offsets = [0, 0], sizes = [2, 32], strides = [1, 1]} : vector<2x128xf32> to vector<2x32xf32>
    %109 = vector.extract_strided_slice %106 {offsets = [0, 32], sizes = [2, 32], strides = [1, 1]} : vector<2x128xf32> to vector<2x32xf32>
    %110 = vector.extract_strided_slice %107 {offsets = [0, 64], sizes = [2, 32], strides = [1, 1]} : vector<2x128xf32> to vector<2x32xf32>
    %111 = vector.extract_strided_slice %106 {offsets = [0, 96], sizes = [2, 32], strides = [1, 1]} : vector<2x128xf32> to vector<2x32xf32>
    %112 = arith.mulf %109, %92 : vector<2x32xf32>
    %113 = arith.mulf %108, %110 : vector<2x32xf32>
    %114 = arith.addf %112, %113 : vector<2x32xf32>
    %115 = math.tanh %114 : vector<2x32xf32>
    %116 = arith.mulf %111, %115 : vector<2x32xf32>
    %c0_28 = arith.constant 0 : index
    %c4 = arith.constant 4 : index
    %c0_29 = arith.constant 0 : index
    %117 = vector.load %arg8[%c0_28, %c4, %c0_29] : memref<2x8x32xf32, #tpu.memory_space<vmem>>, vector<2x1x32xf32>
    %118 = vector.shape_cast %117 : vector<2x1x32xf32> to vector<2x32xf32>
    %119 = vector.shape_cast %116 : vector<2x32xf32> to vector<2x1x32xf32>
    tpu.vector_store %arg8[%c0_28, %c4, %c0_29], %119 {strides = array<i32>} : memref<2x8x32xf32, #tpu.memory_space<vmem>>, vector<2x1x32xf32>,
    %120 = vector.extract_strided_slice %6 {offsets = [0, 5, 0], sizes = [2, 1, 128], strides = [1, 1, 1]} : vector<2x8x128xf32> to vector<2x1x128xf32>
    %121 = vector.shape_cast %120 : vector<2x1x128xf32> to vector<2x128xf32>
    %cst_30 = arith.constant dense<0.000000e+00> : vector<2x128xf32>
    %122 = tpu.matmul %116, %7, %cst_30 {dimension_numbers = #tpu.dot_dimension_numbers<[1], [0], [0], [1], [0, 0, 1, 1], [], []>} : vector<2x32xf32>, vector<32x128xf32>, vector<2x128xf32> -> vector<2x128xf32>
    %123 = arith.addf %121, %122 : vector<2x128xf32>
    %124 = arith.negf %123 : vector<2x128xf32>
    %125 = math.exp %124 : vector<2x128xf32>
    %cst_31 = arith.constant 1.000000e+00 : f32
    %126 = vector.broadcast %cst_31 : f32 to vector<2x128xf32>
    %127 = arith.addf %126, %125 : vector<2x128xf32>
    %128 = arith.divf %126, %127 : vector<2x128xf32>
    %129 = math.tanh %123 : vector<2x128xf32>
    %130 = vector.extract_strided_slice %128 {offsets = [0, 0], sizes = [2, 32], strides = [1, 1]} : vector<2x128xf32> to vector<2x32xf32>
    %131 = vector.extract_strided_slice %128 {offsets = [0, 32], sizes = [2, 32], strides = [1, 1]} : vector<2x128xf32> to vector<2x32xf32>
    %132 = vector.extract_strided_slice %129 {offsets = [0, 64], sizes = [2, 32], strides = [1, 1]} : vector<2x128xf32> to vector<2x32xf32>
    %133 = vector.extract_strided_slice %128 {offsets = [0, 96], sizes = [2, 32], strides = [1, 1]} : vector<2x128xf32> to vector<2x32xf32>
    %134 = arith.mulf %131, %114 : vector<2x32xf32>
    %135 = arith.mulf %130, %132 : vector<2x32xf32>
    %136 = arith.addf %134, %135 : vector<2x32xf32>
    %137 = math.tanh %136 : vector<2x32xf32>
    %138 = arith.mulf %133, %137 : vector<2x32xf32>
    %c0_32 = arith.constant 0 : index
    %c5 = arith.constant 5 : index
    %c0_33 = arith.constant 0 : index
    %139 = vector.load %arg8[%c0_32, %c5, %c0_33] : memref<2x8x32xf32, #tpu.memory_space<vmem>>, vector<2x1x32xf32>
    %140 = vector.shape_cast %139 : vector<2x1x32xf32> to vector<2x32xf32>
    %141 = vector.shape_cast %138 : vector<2x32xf32> to vector<2x1x32xf32>
    tpu.vector_store %arg8[%c0_32, %c5, %c0_33], %141 {strides = array<i32>} : memref<2x8x32xf32, #tpu.memory_space<vmem>>, vector<2x1x32xf32>,
    %142 = vector.extract_strided_slice %6 {offsets = [0, 6, 0], sizes = [2, 1, 128], strides = [1, 1, 1]} : vector<2x8x128xf32> to vector<2x1x128xf32>
    %143 = vector.shape_cast %142 : vector<2x1x128xf32> to vector<2x128xf32>
    %cst_34 = arith.constant dense<0.000000e+00> : vector<2x128xf32>
    %144 = tpu.matmul %138, %7, %cst_34 {dimension_numbers = #tpu.dot_dimension_numbers<[1], [0], [0], [1], [0, 0, 1, 1], [], []>} : vector<2x32xf32>, vector<32x128xf32>, vector<2x128xf32> -> vector<2x128xf32>
    %145 = arith.addf %143, %144 : vector<2x128xf32>
    %146 = arith.negf %145 : vector<2x128xf32>
    %147 = math.exp %146 : vector<2x128xf32>
    %cst_35 = arith.constant 1.000000e+00 : f32
    %148 = vector.broadcast %cst_35 : f32 to vector<2x128xf32>
    %149 = arith.addf %148, %147 : vector<2x128xf32>
    %150 = arith.divf %148, %149 : vector<2x128xf32>
    %151 = math.tanh %145 : vector<2x128xf32>
    %152 = vector.extract_strided_slice %150 {offsets = [0, 0], sizes = [2, 32], strides = [1, 1]} : vector<2x128xf32> to vector<2x32xf32>
    %153 = vector.extract_strided_slice %150 {offsets = [0, 32], sizes = [2, 32], strides = [1, 1]} : vector<2x128xf32> to vector<2x32xf32>
    %154 = vector.extract_strided_slice %151 {offsets = [0, 64], sizes = [2, 32], strides = [1, 1]} : vector<2x128xf32> to vector<2x32xf32>
    %155 = vector.extract_strided_slice %150 {offsets = [0, 96], sizes = [2, 32], strides = [1, 1]} : vector<2x128xf32> to vector<2x32xf32>
    %156 = arith.mulf %153, %136 : vector<2x32xf32>
    %157 = arith.mulf %152, %154 : vector<2x32xf32>
    %158 = arith.addf %156, %157 : vector<2x32xf32>
    %159 = math.tanh %158 : vector<2x32xf32>
    %160 = arith.mulf %155, %159 : vector<2x32xf32>
    %c0_36 = arith.constant 0 : index
    %c6 = arith.constant 6 : index
    %c0_37 = arith.constant 0 : index
    %161 = vector.load %arg8[%c0_36, %c6, %c0_37] : memref<2x8x32xf32, #tpu.memory_space<vmem>>, vector<2x1x32xf32>
    %162 = vector.shape_cast %161 : vector<2x1x32xf32> to vector<2x32xf32>
    %163 = vector.shape_cast %160 : vector<2x32xf32> to vector<2x1x32xf32>
    tpu.vector_store %arg8[%c0_36, %c6, %c0_37], %163 {strides = array<i32>} : memref<2x8x32xf32, #tpu.memory_space<vmem>>, vector<2x1x32xf32>,
    %164 = vector.extract_strided_slice %6 {offsets = [0, 7, 0], sizes = [2, 1, 128], strides = [1, 1, 1]} : vector<2x8x128xf32> to vector<2x1x128xf32>
    %165 = vector.shape_cast %164 : vector<2x1x128xf32> to vector<2x128xf32>
    %cst_38 = arith.constant dense<0.000000e+00> : vector<2x128xf32>
    %166 = tpu.matmul %160, %7, %cst_38 {dimension_numbers = #tpu.dot_dimension_numbers<[1], [0], [0], [1], [0, 0, 1, 1], [], []>} : vector<2x32xf32>, vector<32x128xf32>, vector<2x128xf32> -> vector<2x128xf32>
    %167 = arith.addf %165, %166 : vector<2x128xf32>
    %168 = arith.negf %167 : vector<2x128xf32>
    %169 = math.exp %168 : vector<2x128xf32>
    %cst_39 = arith.constant 1.000000e+00 : f32
    %170 = vector.broadcast %cst_39 : f32 to vector<2x128xf32>
    %171 = arith.addf %170, %169 : vector<2x128xf32>
    %172 = arith.divf %170, %171 : vector<2x128xf32>
    %173 = math.tanh %167 : vector<2x128xf32>
    %174 = vector.extract_strided_slice %172 {offsets = [0, 0], sizes = [2, 32], strides = [1, 1]} : vector<2x128xf32> to vector<2x32xf32>
    %175 = vector.extract_strided_slice %172 {offsets = [0, 32], sizes = [2, 32], strides = [1, 1]} : vector<2x128xf32> to vector<2x32xf32>
    %176 = vector.extract_strided_slice %173 {offsets = [0, 64], sizes = [2, 32], strides = [1, 1]} : vector<2x128xf32> to vector<2x32xf32>
    %177 = vector.extract_strided_slice %172 {offsets = [0, 96], sizes = [2, 32], strides = [1, 1]} : vector<2x128xf32> to vector<2x32xf32>
    %178 = arith.mulf %175, %158 : vector<2x32xf32>
    %179 = arith.mulf %174, %176 : vector<2x32xf32>
    %180 = arith.addf %178, %179 : vector<2x32xf32>
    %181 = math.tanh %180 : vector<2x32xf32>
    %182 = arith.mulf %177, %181 : vector<2x32xf32>
    %c0_40 = arith.constant 0 : index
    %c7 = arith.constant 7 : index
    %c0_41 = arith.constant 0 : index
    %183 = vector.load %arg8[%c0_40, %c7, %c0_41] : memref<2x8x32xf32, #tpu.memory_space<vmem>>, vector<2x1x32xf32>
    %184 = vector.shape_cast %183 : vector<2x1x32xf32> to vector<2x32xf32>
    %185 = vector.shape_cast %182 : vector<2x32xf32> to vector<2x1x32xf32>
    tpu.vector_store %arg8[%c0_40, %c7, %c0_41], %185 {strides = array<i32>} : memref<2x8x32xf32, #tpu.memory_space<vmem>>, vector<2x1x32xf32>,
    %c0_42 = arith.constant 0 : index
    %c0_43 = arith.constant 0 : index
    %c0_44 = arith.constant 0 : index
    %186 = vector.load %arg8[%c0_42, %c0_43, %c0_44] : memref<2x8x32xf32, #tpu.memory_space<vmem>>, vector<2x8x32xf32>
    %187 = vector.shape_cast %186 : vector<2x8x32xf32> to vector<16x32xf32>
    %c0_45 = arith.constant 0 : index
    %c0_46 = arith.constant 0 : index
    %188 = vector.load %arg5[%c0_45, %c0_46] : memref<32x8xf32, #tpu.memory_space<vmem>>, vector<32x8xf32>
    %cst_47 = arith.constant dense<0.000000e+00> : vector<16x8xf32>
    %189 = tpu.matmul %187, %188, %cst_47 {dimension_numbers = #tpu.dot_dimension_numbers<[1], [0], [0], [1], [0, 0, 1, 1], [], []>} : vector<16x32xf32>, vector<32x8xf32>, vector<16x8xf32> -> vector<16x8xf32>
    %c0_48 = arith.constant 0 : index
    %c0_49 = arith.constant 0 : index
    %190 = vector.load %arg6[%c0_48, %c0_49] : memref<1x8xf32, #tpu.memory_space<vmem>>, vector<1x8xf32>
    %191 = vector.broadcast %190 : vector<1x8xf32> to vector<16x8xf32>
    %192 = arith.addf %189, %191 : vector<16x8xf32>
    %cst_50 = arith.constant dense<0xFF800000> : vector<16xf32>
    %193 = vector.multi_reduction <maximumf>, %192, %cst_50 [1] : vector<16x8xf32> to vector<16xf32>
    %194 = vector.shape_cast %193 : vector<16xf32> to vector<16x1xf32>
    %195 = vector.broadcast %194 : vector<16x1xf32> to vector<16x8xf32>
    %196 = arith.subf %192, %195 : vector<16x8xf32>
    %197 = math.exp %196 : vector<16x8xf32>
    %cst_51 = arith.constant dense<0.000000e+00> : vector<16xf32>
    %198 = vector.multi_reduction <add>, %197, %cst_51 [1] : vector<16x8xf32> to vector<16xf32>
    %199 = vector.shape_cast %198 : vector<16xf32> to vector<16x1xf32>
    %200 = math.log %199 : vector<16x1xf32>
    %201 = arith.addf %194, %200 : vector<16x1xf32>
    %202 = vector.broadcast %201 : vector<16x1xf32> to vector<16x8xf32>
    %203 = arith.subf %192, %202 : vector<16x8xf32>
    %c0_52 = arith.constant 0 : index
    %c0_53 = arith.constant 0 : index
    %204 = vector.load %arg7[%c0_52, %c0_53] : memref<16x8xf32, #tpu.memory_space<vmem>>, vector<16x8xf32>
    tpu.vector_store %arg7[%c0_52, %c0_53], %203 {strides = array<i32>} : memref<16x8xf32, #tpu.memory_space<vmem>>, vector<16x8xf32>,
    return
  }
  func.func @transform_0(%arg0: i32) -> (i32, i32) {
    %c0_i32 = arith.constant 0 : i32
    %c0_i32_0 = arith.constant 0 : i32
    %c0_i32_1 = arith.constant 0 : i32
    return %c0_i32, %c0_i32_0 : i32, i32
  }
  func.func @transform_1(%arg0: i32) -> (i32, i32) {
    %c0_i32 = arith.constant 0 : i32
    %c0_i32_0 = arith.constant 0 : i32
    %c0_i32_1 = arith.constant 0 : i32
    return %c0_i32, %c0_i32_0 : i32, i32
  }
  func.func @transform_2(%arg0: i32) -> (i32, i32) {
    %c0_i32 = arith.constant 0 : i32
    %c0_i32_0 = arith.constant 0 : i32
    %c0_i32_1 = arith.constant 0 : i32
    return %c0_i32, %c0_i32_0 : i32, i32
  }
  func.func @transform_3(%arg0: i32) -> (i32, i32) {
    %c0_i32 = arith.constant 0 : i32
    %c0_i32_0 = arith.constant 0 : i32
    %c0_i32_1 = arith.constant 0 : i32
    return %c0_i32, %c0_i32_0 : i32, i32
  }
  func.func @transform_4(%arg0: i32) -> (i32, i32) {
    %c0_i32 = arith.constant 0 : i32
    %c0_i32_0 = arith.constant 0 : i32
    %c0_i32_1 = arith.constant 0 : i32
    return %c0_i32, %c0_i32_0 : i32, i32
  }
  func.func @transform_5(%arg0: i32) -> (i32, i32) {
    %c0_i32 = arith.constant 0 : i32
    %c0_i32_0 = arith.constant 0 : i32
    %c0_i32_1 = arith.constant 0 : i32
    return %c0_i32, %c0_i32_0 : i32, i32
  }
  func.func @transform_6(%arg0: i32) -> (i32, i32) {
    %c0_i32 = arith.constant 0 : i32
    %c0_i32_0 = arith.constant 0 : i32
    %c0_i32_1 = arith.constant 0 : i32
    return %c0_i32, %c0_i32_0 : i32, i32
  }
}

</mosaic_0001>

<bundles_post_ra>
// kernel: tpu_custom_call.1
= control target key start
LH: loop header
LB: loop body
LE: loop exit
PB: predicated region body
PF: predicated region fallthrough
CT: control target
= control target key end

     0   :  { %11 = vsyncpa [#allocation4], 0  ;;  %s2183_s0 = inlined_call_operand.hbm [shape: f32[16,16], index: 0, kind: input, shape index: {}]   ;;  %s2184_s1 = inlined_call_operand.hbm [shape: f32[16,128], index: 1, kind: input, shape index: {}]   ;;  %s2185_s2 = inlined_call_operand.vmem [shape: f32[32,128], index: 2, kind: input, shape index: {}]   ;;  %s2186_s3 = inlined_call_operand.vmem [shape: f32[1,128], index: 3, kind: input, shape index: {}]   ;;  %s2187_s4 = inlined_call_operand.vmem [shape: f32[32,8], index: 4, kind: input, shape index: {}]   ;;  %s2188_s5 = inlined_call_operand.vmem [shape: f32[1,8], index: 5, kind: input, shape index: {}]   ;;  %s2189_s6 = inlined_call_operand.vmem [shape: f32[16,8], index: 6, kind: output, shape index: {}]  }
   0x1   :  { %12 = vsyncpa [#allocation6], 0  ;;  %s1830_s21 = smov [#allocation3]  }
   0x2   :  { %s18_s22 = sshll.u32 %s1830_s21, 4  ;;  %s19_s22 = int_to_ptr.vmem [resolvable:$true] %s18_s22 }
   0x3   :  { %s1794_s23 = scalar_lea.vmem %s19_s22, 256  ;;  %p1799_p1 = scmp.lt.s32.totalorder %s19_s22, %s19_s22 }
   0x4   :  { %p1795_p0 = scmp.ne.s32.totalorder %s19_s22, %s1794_s23  ;;  %p1800_p2 = scmp.lt.s32.totalorder %s1794_s23, %s1794_s23 }
   0x6   :  { %p1801_p3 = por %p1800_p2, %p1799_p1 }
   0x8   :  { %p1802_p4 = pnand %p1801_p3, %p1795_p0 }
   0xa   :  { %1805 = shalt.err (!%p1802_p4)
}
   0xb   :  { %s1831_s24 = smov 128   ;;  %s1832_s25 = smov 8  }
   0xc   :  { %24 = dma.hbm_to_vmem [thread:$0]  %s2183_s0, 256, %s19_s22, [#allocation4], %s1831_s24, %s1831_s24, %s1832_s25  }
   0xd   :  { %s1833_s28 = smov [#allocation5]  }
   0xe   :  { %s30_s29 = sshll.u32 %s1833_s28, 4  ;;  %s31_s29 = int_to_ptr.vmem [resolvable:$true] %s30_s29 }
   0xf   :  { %s1814_s30 = scalar_lea.vmem %s31_s29, 256  ;;  %p1819_p6 = scmp.lt.s32.totalorder %s31_s29, %s31_s29 }
  0x10   :  { %p1815_p5 = scmp.ne.s32.totalorder %s31_s29, %s1814_s30  ;;  %p1820_p7 = scmp.lt.s32.totalorder %s1814_s30, %s1814_s30 }
  0x12   :  { %p1821_p8 = por %p1820_p7, %p1819_p6 }
  0x14   :  { %p1822_p9 = pnand %p1821_p8, %p1815_p5 }
  0x16   :  { %1825 = shalt.err (!%p1822_p9)
}
  0x17   :  { %36 = dma.hbm_to_vmem [thread:$0]  %s2184_s1, 256, %s31_s29, [#allocation6], %s1831_s24, %s1831_s24, %s1832_s25  }
  0x18   :  { %1826 = dma.done.wait [#allocation4], 256  }
  0x19   :  { %1827 = vsyncadd [#allocation4], 4294967040 }
  0x1a   :  { %1828 = dma.done.wait [#allocation6], 256  }
  0x1b   :  { %1829 = vsyncadd [#allocation6], 4294967040  ;;  %v1834_v0 = vmov 0.0   ;;  %vm1835_vm0 = vmmov 0   ;;  %v54_v1 = vld [vmem:[#allocation5 + $0x8] sm:$0xff]  ;;  %v1885_v2 = vld [vmem:[%s2185_s2 + $0x18] sm:$0xff] }
  0x1c   :  { %1543 = vmatprep.subr.mxu1 %v1834_v0  ;;  %1551 = vmatprep.mubr.msk.f32.mxu1 %vm1835_vm0, %v1834_v0  ;;  %v53_v3 = vld [vmem:[#allocation5] sm:$0xff]  ;;  %v1891_v4 = vld [vmem:[%s2185_s2 + $0x10] sm:$0xff]  ;;  %vm62_vm1 = vcmask 130048   ;;  %v52_v6 = vld [vmem:[#allocation3 + $0x8] sm:$0xff]  ;;  %s1836_s16 = smov 64   ;;  %vm288_vm2 = vcmask 1041409  }
  0x1d   :  { %1536 = vmatprep.subr.mxu0 %v54_v1  ;;  %1544 = vmatpush3.msra.mxu1 %v1885_v2  ;;  %v51_v5 = vld [vmem:[#allocation3] sm:$0xff]  ;;  %v1898_v7 = vld [vmem:[%s2185_s2 + $0x8] sm:$0xff]  ;;  %v1904_v8 = vld [vmem:[%s2185_s2] sm:$0xff]  ;;  %vm148_vm3 = vcmask 261120   ;;  %vm284_vm4 = vcmask 253952   ;;  %vm432_vm5 = vcmask 254977  }
  0x1e   :  { %1537 = vmatpush3.msra.mxu0 %v54_v1  ;;  %1545 = vmatprep.subr.mxu1 %v1834_v0  ;;  %v1457_v10 = vld [vmem:[%s2186_s3] ss:$0 sm:$0xff]  ;;  %s1837_s3 = smov 32   ;;  %vm580_vm6 = vcmask 256002   ;;  %vm729_vm7 = vcmask 257027   ;;  %vm878_vm8 = vcmask 258052  }
  0x1f   :  { %1538 = vmatprep.subr.mxu0 %v53_v3  ;;  %1546 = vmatpush3.msra.mxu1 %v1891_v4  ;;  %vm1027_vm9 = vcmask 259077   ;;  %vm1176_vm10 = vcmask 260102   ;;  %vm1325_vm11 = vcmask 261127   ;;  %vm1422_vm12 = vcmask 64512  }
  0x20   :  { %1539 = vmatpush3.msra.mxu0 %v53_v3  ;;  %1540 = vmatprep.mubr.msk.f32.mxu0 %vm62_vm1, %v51_v5 }
  0x21   :  { %1547 = vmatprep.subr.mxu1 %v1834_v0  ;;  %1541 = vmatmul.mubr.msk.f32.vlgmr.msra.gmra.mxu0 %vm62_vm1, %v52_v6 }
  0x22   :  { %1548 = vmatpush3.msra.mxu1 %v1898_v7  ;;  %1554 = vmatprep.subr.mxu0 %v1834_v0 }
  0x23   :  { %1549 = vmatprep.subr.mxu1 %v1834_v0  ;;  %1555 = vmatpush3.msra.mxu0 %v1885_v2 }
  0x24   :  { %1550 = vmatpush3.msra.mxu1 %v1904_v8  ;;  %1556 = vmatprep.subr.mxu0 %v1834_v0 }
  0x25   :  { %1552 = vmatmul.mubr.f32.vlgmr.msra.gmra.mxu1 %v1834_v0  ;;  %1557 = vmatpush3.msra.mxu0 %v1891_v4 }
  0x26   :  { %1558 = vmatprep.subr.mxu0 %v1834_v0  ;;  %1562 = vmatprep.mubr.msk.f32.mxu0 %vm1835_vm0, %v1834_v0 }
  0x27   :  { %1559 = vmatpush3.msra.mxu0 %v1898_v7  ;;  %1565 = vmatprep.subr.mxu1 %v1834_v0 }
  0x28   :  { %1560 = vmatprep.subr.mxu0 %v1834_v0  ;;  %1566 = vmatpush3.msra.mxu1 %v1885_v2 }
  0x29   :  { %1561 = vmatpush3.msra.mxu0 %v1904_v8  ;;  %1567 = vmatprep.subr.mxu1 %v1834_v0 }
  0x2a   :  { %1568 = vmatpush3.msra.mxu1 %v1891_v4  ;;  %1573 = vmatprep.mubr.msk.f32.mxu1 %vm1835_vm0, %v1834_v0 }
  0x2b   :  { %1569 = vmatprep.subr.mxu1 %v1834_v0  ;;  %1576 = vmatprep.subr.mxu0 %v1834_v0 }
  0x2c   :  { %1570 = vmatpush3.msra.mxu1 %v1898_v7 }
  0x2d   :  { %1571 = vmatprep.subr.mxu1 %v1834_v0 }
  0x2e   :  { %1572 = vmatpush3.msra.mxu1 %v1904_v8 }
  0x2f   :  { %1587 = vmatprep.subr.mxu1 %v1834_v0 }
  0xe1   :  { %v1542_v9 = vpop.f32.mrf.mxu0 }
  0xe2   :  { %v1935_v11 = vadd.f32 %v1542_v9, %v1457_v10 }
  0xe3   :  { %v135_v12 = vpop.f32.mrf.mxu0 }
  0xe4   :  { %v1937_v15 = vadd.f32 %v1457_v10, %v135_v12 }
  0xe5   :  { %v218_v13 = vpop.f32.mrf.mxu1 }
  0xe6   :  { %v223_v14 = vrot.slane %v218_v13, 1  ;;  %v226_v18 = vadd.f32 %v218_v13, %v1937_v15 }
  0xe7   :  { %v1553_v16 = vpop.f32.mrf.mxu1 }
  0xe8   :  { %v227_v17 = vadd.f32 %v223_v14, %v1935_v11  ;;  %v1460_v22 = vmul.f32 -1.442695, %v226_v18 }
  0xea   :  { %1650 = vtanh.f32 %v227_v17  ;;  %v1461_v21 = vmul.f32 -1.442695, %v227_v17 }
  0xeb   :  { %1652 = vtanh.f32 %v226_v18 }
  0xec   :  { %1654 = vpow2.f32 %v1461_v21 }
  0xed   :  { %1656 = vpow2.f32 %v1460_v22 }
  0xf7   :  { %v1651_v19 = vpop.eup %1650 }
  0xf8   :  { %248 = vrot.lane.b32.xlu0 %v1651_v19, %s1836_s16  ;;  %v1653_v20 = vpop.eup %1652 }
  0xf9   :  { %v1655_v23 = vpop.eup %1654 }
  0xfa   :  { %v235_v24 = vadd.f32 1.0, %v1655_v23  ;;  %v1657_v25 = vpop.eup %1656 }
  0xfb   :  { %v234_v26 = vadd.f32 1.0, %v1657_v25 }
  0xfc   :  { %246 = vrot.lane.b32.xlu0 %v1653_v20, %s1836_s16  ;;  %1658 = vrcp.f32 %v235_v24 }
  0xfd   :  { %1660 = vrcp.f32 %v234_v26 }
 0x109   :  { %v1659_v27 = vpop.eup %1658 }
 0x10a   :  { %v1661_v30 = vpop.eup %1660  ;;  %v243_v33 = vmul.f32 0.0, %v1659_v27 }
 0x10b   :  { %v242_v36 = vmul.f32 0.0, %v1661_v30 }
 0x16a   :  { %v249_v28 = vpop.permute.xlu0 %248 }
 0x16b   :  { %v253_v29 = vmul.f32 %v1659_v27, %v249_v28 }
 0x16d   :  { %258 = vrot.lane.b32.xlu1 %v253_v29, %s1837_s3 }
 0x16e   :  { %v247_v31 = vpop.permute.xlu0 %246 }
 0x16f   :  { %v252_v32 = vmul.f32 %v1661_v30, %v247_v31 }
 0x171   :  { %256 = vrot.lane.b32.xlu1 %v252_v32, %s1837_s3 }
 0x1df   :  { %v259_v34 = vpop.permute.xlu1 %258 }
 0x1e0   :  { %v263_v35 = vadd.f32 %v259_v34, %v243_v33 }
 0x1e2   :  { %1662 = vtanh.f32 %v263_v35  ;;  %v387_v6 = vrot.slane %v263_v35, 7 }
 0x1e3   :  { %v257_v37 = vpop.permute.xlu1 %256 }
 0x1e4   :  { %v262_v38 = vadd.f32 %v257_v37, %v242_v36 }
 0x1e6   :  { %1664 = vtanh.f32 %v262_v38  ;;  %v386_v10 = vrot.slane %v262_v38, 7 }
 0x1ef   :  { %v1663_v39 = vpop.eup %1662 }
 0x1f0   :  { %270 = vrot.lane.b32.xlu0 %v1663_v39, %s1836_s16 }
 0x1f3   :  { %v1665_v40 = vpop.eup %1664 }
 0x1f4   :  { %268 = vrot.lane.b32.xlu1 %v1665_v40, %s1836_s16 }
 0x262   :  { %v271_v41 = vpop.permute.xlu0 %270 }
 0x263   :  { %v1947_v42 = vmul.f32 %v1659_v27, %v271_v41 }
 0x265   :  { %v287_v44 = vrot.slane %v1947_v42, 7 }
 0x266   :  { %v269_v43 = vpop.permute.xlu1 %268 }
 0x267   :  { %v1950_v45 = vmul.f32 %v1661_v30, %v269_v43 }
 0x269   :  { %v289_v46 = vsel %vm288_vm2, %v287_v44, %v1950_v45 }
 0x26a   :  { %290 = vrot.lane.b32.xlu0 %v289_v46, %s1837_s3 }
 0x2dc   :  { %v291_v47 = vpop.permute.xlu0 %290 }
 0x2dd   :  { %1563 = vmatmul.mubr.msk.f32.vlgmr.msra.gmra.mxu0 %vm148_vm3, %v291_v47 }
 0x2de   :  { %1577 = vmatpush3.msra.mxu0 %v1885_v2  ;;  %1584 = vmatprep.mubr.msk.f32.mxu0 %vm1835_vm0, %v1834_v0 }
 0x2df   :  { %1578 = vmatprep.subr.mxu0 %v1834_v0 }
 0x2e0   :  { %1579 = vmatpush3.msra.mxu0 %v1891_v4 }
 0x2e1   :  { %1580 = vmatprep.subr.mxu0 %v1834_v0 }
 0x2e2   :  { %1581 = vmatpush3.msra.mxu0 %v1898_v7 }
 0x2e3   :  { %1582 = vmatprep.subr.mxu0 %v1834_v0 }
 0x2e4   :  { %1583 = vmatpush3.msra.mxu0 %v1904_v8 }
 0x2e5   :  { %1598 = vmatprep.subr.mxu0 %v1834_v0 }
 0x39d   :  { %v360_v48 = vpop.f32.mrf.mxu0 }
 0x39e   :  { %v365_v49 = vrot.slane %v360_v48, 7  ;;  %v369_v50 = vadd.f32 %v360_v48, %v1935_v11 }
 0x39f   :  { %v1564_v51 = vpop.f32.mrf.mxu0 }
 0x3a0   :  { %v368_v52 = vadd.f32 %v365_v49, %v1937_v15  ;;  %1666 = vtanh.f32 %v369_v50  ;;  %v1464_v55 = vmul.f32 -1.442695, %v369_v50 }
 0x3a2   :  { %1668 = vtanh.f32 %v368_v52  ;;  %v1463_v56 = vmul.f32 -1.442695, %v368_v52 }
 0x3a3   :  { %1670 = vpow2.f32 %v1464_v55 }
 0x3a4   :  { %1672 = vpow2.f32 %v1463_v56 }
 0x3ad   :  { %v1667_v53 = vpop.eup %1666 }
 0x3ae   :  { %396 = vrot.lane.b32.xlu0 %v1667_v53, %s1836_s16 }
 0x3af   :  { %v1669_v54 = vpop.eup %1668 }
 0x3b0   :  { %394 = vrot.lane.b32.xlu1 %v1669_v54, %s1836_s16  ;;  %v1671_v57 = vpop.eup %1670 }
 0x3b1   :  { %v1673_v58 = vpop.eup %1672  ;;  %v377_v59 = vadd.f32 1.0, %v1671_v57 }
 0x3b2   :  { %v376_v60 = vadd.f32 1.0, %v1673_v58 }
 0x3b3   :  { %1674 = vrcp.f32 %v377_v59 }
 0x3b4   :  { %1676 = vrcp.f32 %v376_v60 }
 0x3c0   :  { %v1675_v61 = vpop.eup %1674 }
 0x3c1   :  { %v1677_v1 = vpop.eup %1676  ;;  %v391_v9 = vmul.f32 %v1675_v61, %v387_v6 }
 0x3c2   :  { %v390_v14 = vmul.f32 %v1677_v1, %v386_v10 }
 0x420   :  { %v397_v62 = vpop.permute.xlu0 %396 }
 0x421   :  { %v401_v63 = vmul.f32 %v1675_v61, %v397_v62 }
 0x422   :  { %v395_v3 = vpop.permute.xlu1 %394 }
 0x423   :  { %406 = vrot.lane.b32.xlu0 %v401_v63, %s1837_s3  ;;  %v400_v5 = vmul.f32 %v1677_v1, %v395_v3 }
 0x425   :  { %404 = vrot.lane.b32.xlu1 %v400_v5, %s1837_s3 }
 0x495   :  { %v407_v12 = vpop.permute.xlu0 %406 }
 0x496   :  { %v411_v13 = vadd.f32 %v407_v12, %v391_v9 }
 0x497   :  { %v405_v16 = vpop.permute.xlu1 %404 }
 0x498   :  { %1678 = vtanh.f32 %v411_v13  ;;  %v410_v17 = vadd.f32 %v405_v16, %v390_v14  ;;  %v535_v50 = vrot.slane %v411_v13, 7 }
 0x49a   :  { %1680 = vtanh.f32 %v410_v17  ;;  %v534_v49 = vrot.slane %v410_v17, 7 }
 0x4a5   :  { %v1679_v18 = vpop.eup %1678 }
 0x4a6   :  { %418 = vrot.lane.b32.xlu0 %v1679_v18, %s1836_s16 }
 0x4a7   :  { %v1681_v19 = vpop.eup %1680 }
 0x4a8   :  { %416 = vrot.lane.b32.xlu1 %v1681_v19, %s1836_s16 }
 0x518   :  { %v419_v20 = vpop.permute.xlu0 %418 }
 0x519   :  { %v1976_v23 = vmul.f32 %v1675_v61, %v419_v20 }
 0x51a   :  { %v417_v21 = vpop.permute.xlu1 %416 }
 0x51b   :  { %v1974_v22 = vmul.f32 %v1677_v1, %v417_v21 }
 0x51d   :  { %v435_v24 = vrot.slane %v1974_v22, 1 }
 0x51f   :  { %v436_v25 = vsel %vm288_vm2, %v1976_v23, %v435_v24 }
 0x520   :  { %437 = vrot.lane.b32.xlu1 %v436_v25, %s1837_s3 }
 0x592   :  { %v438_v26 = vpop.permute.xlu1 %437 }
 0x593   :  { %1574 = vmatmul.mubr.msk.f32.vlgmr.msra.gmra.mxu1 %vm148_vm3, %v438_v26 }
 0x594   :  { %1588 = vmatpush3.msra.mxu1 %v1885_v2  ;;  %1595 = vmatprep.mubr.msk.f32.mxu1 %vm1835_vm0, %v1834_v0 }
 0x595   :  { %1589 = vmatprep.subr.mxu1 %v1834_v0 }
 0x596   :  { %1590 = vmatpush3.msra.mxu1 %v1891_v4 }
 0x597   :  { %1591 = vmatprep.subr.mxu1 %v1834_v0 }
 0x598   :  { %1592 = vmatpush3.msra.mxu1 %v1898_v7 }
 0x599   :  { %1593 = vmatprep.subr.mxu1 %v1834_v0 }
 0x59a   :  { %1594 = vmatpush3.msra.mxu1 %v1904_v8 }
 0x59b   :  { %1609 = vmatprep.subr.mxu1 %v1834_v0 }
 0x653   :  { %v507_v27 = vpop.f32.mrf.mxu1 }
 0x654   :  { %v512_v28 = vrot.slane %v507_v27, 6  ;;  %v513_v29 = vrot.slane %v507_v27, 7 }
 0x655   :  { %v1575_v30 = vpop.f32.mrf.mxu1 }
 0x656   :  { %v516_v31 = vadd.f32 %v512_v28, %v1937_v15  ;;  %v517_v32 = vadd.f32 %v513_v29, %v1935_v11 }
 0x658   :  { %1682 = vtanh.f32 %v516_v31  ;;  %v1466_v35 = vmul.f32 -1.442695, %v516_v31  ;;  %v1467_v36 = vmul.f32 -1.442695, %v517_v32 }
 0x659   :  { %1684 = vtanh.f32 %v517_v32 }
 0x65a   :  { %1686 = vpow2.f32 %v1466_v35 }
 0x65b   :  { %1688 = vpow2.f32 %v1467_v36 }
 0x665   :  { %v1683_v33 = vpop.eup %1682 }
 0x666   :  { %v1685_v34 = vpop.eup %1684  ;;  %542 = vrot.lane.b32.xlu0 %v1683_v33, %s1836_s16 }
 0x667   :  { %544 = vrot.lane.b32.xlu1 %v1685_v34, %s1836_s16  ;;  %v1687_v37 = vpop.eup %1686 }
 0x668   :  { %v1689_v38 = vpop.eup %1688  ;;  %v524_v39 = vadd.f32 1.0, %v1687_v37 }
 0x669   :  { %v525_v40 = vadd.f32 1.0, %v1689_v38 }
 0x66a   :  { %1690 = vrcp.f32 %v524_v39 }
 0x66b   :  { %1692 = vrcp.f32 %v525_v40 }
 0x677   :  { %v1691_v41 = vpop.eup %1690 }
 0x678   :  { %v1693_v44 = vpop.eup %1692  ;;  %v538_v51 = vmul.f32 %v1691_v41, %v534_v49 }
 0x679   :  { %v539_v52 = vmul.f32 %v1693_v44, %v535_v50 }
 0x6d8   :  { %v543_v43 = vpop.permute.xlu0 %542 }
 0x6d9   :  { %v545_v46 = vpop.permute.xlu1 %544  ;;  %v548_v47 = vmul.f32 %v1691_v41, %v543_v43 }
 0x6da   :  { %v549_v48 = vmul.f32 %v1693_v44, %v545_v46 }
 0x6db   :  { %552 = vrot.lane.b32.xlu0 %v548_v47, %s1837_s3 }
 0x6dc   :  { %554 = vrot.lane.b32.xlu1 %v549_v48, %s1837_s3 }
 0x74d   :  { %v553_v53 = vpop.permute.xlu0 %552 }
 0x74e   :  { %v555_v54 = vpop.permute.xlu1 %554  ;;  %v558_v55 = vadd.f32 %v553_v53, %v538_v51 }
 0x74f   :  { %v559_v56 = vadd.f32 %v555_v54, %v539_v52 }
 0x750   :  { %1694 = vtanh.f32 %v558_v55  ;;  %v683_v32 = vrot.slane %v558_v55, 7 }
 0x751   :  { %1696 = vtanh.f32 %v559_v56  ;;  %v684_v33 = vrot.slane %v559_v56, 7 }
 0x75d   :  { %v1695_v57 = vpop.eup %1694 }
 0x75e   :  { %v1697_v58 = vpop.eup %1696  ;;  %564 = vrot.lane.b32.xlu0 %v1695_v57, %s1836_s16 }
 0x75f   :  { %566 = vrot.lane.b32.xlu1 %v1697_v58, %s1836_s16 }
 0x7d0   :  { %v565_v59 = vpop.permute.xlu0 %564 }
 0x7d1   :  { %v567_v60 = vpop.permute.xlu1 %566  ;;  %v2001_v61 = vmul.f32 %v1691_v41, %v565_v59 }
 0x7d2   :  { %v2003_v62 = vmul.f32 %v1693_v44, %v567_v60 }
 0x7d3   :  { %v583_v63 = vrot.slane %v2001_v61, 2 }
 0x7d4   :  { %v584_v1 = vrot.slane %v2003_v62, 1 }
 0x7d6   :  { %v585_v3 = vsel %vm288_vm2, %v584_v1, %v583_v63 }
 0x7d7   :  { %586 = vrot.lane.b32.xlu0 %v585_v3, %s1837_s3 }
 0x849   :  { %v587_v5 = vpop.permute.xlu0 %586 }
 0x84a   :  { %1585 = vmatmul.mubr.msk.f32.vlgmr.msra.gmra.mxu0 %vm148_vm3, %v587_v5 }
 0x84b   :  { %1599 = vmatpush3.msra.mxu0 %v1885_v2  ;;  %1606 = vmatprep.mubr.msk.f32.mxu0 %vm1835_vm0, %v1834_v0 }
 0x84c   :  { %1600 = vmatprep.subr.mxu0 %v1834_v0 }
 0x84d   :  { %1601 = vmatpush3.msra.mxu0 %v1891_v4 }
 0x84e   :  { %1602 = vmatprep.subr.mxu0 %v1834_v0 }
 0x84f   :  { %1603 = vmatpush3.msra.mxu0 %v1898_v7 }
 0x850   :  { %1604 = vmatprep.subr.mxu0 %v1834_v0 }
 0x851   :  { %1605 = vmatpush3.msra.mxu0 %v1904_v8 }
 0x852   :  { %1620 = vmatprep.subr.mxu0 %v1834_v0 }
 0x90a   :  { %v656_v6 = vpop.f32.mrf.mxu0 }
 0x90b   :  { %v661_v9 = vrot.slane %v656_v6, 5  ;;  %v662_v10 = vrot.slane %v656_v6, 6 }
 0x90c   :  { %v1586_v12 = vpop.f32.mrf.mxu0 }
 0x90d   :  { %v665_v13 = vadd.f32 %v661_v9, %v1937_v15  ;;  %v666_v14 = vadd.f32 %v662_v10, %v1935_v11 }
 0x90f   :  { %1698 = vtanh.f32 %v665_v13  ;;  %v1469_v18 = vmul.f32 -1.442695, %v665_v13  ;;  %v1470_v19 = vmul.f32 -1.442695, %v666_v14 }
 0x910   :  { %1700 = vtanh.f32 %v666_v14 }
 0x911   :  { %1702 = vpow2.f32 %v1469_v18 }
 0x912   :  { %1704 = vpow2.f32 %v1470_v19 }
 0x91c   :  { %v1699_v16 = vpop.eup %1698 }
 0x91d   :  { %v1701_v17 = vpop.eup %1700  ;;  %691 = vrot.lane.b32.xlu1 %v1699_v16, %s1836_s16 }
 0x91e   :  { %693 = vrot.lane.b32.xlu0 %v1701_v17, %s1836_s16  ;;  %v1703_v20 = vpop.eup %1702 }
 0x91f   :  { %v1705_v21 = vpop.eup %1704  ;;  %v673_v24 = vadd.f32 1.0, %v1703_v20 }
 0x920   :  { %v674_v25 = vadd.f32 1.0, %v1705_v21 }
 0x921   :  { %1706 = vrcp.f32 %v673_v24 }
 0x922   :  { %1708 = vrcp.f32 %v674_v25 }
 0x92e   :  { %v1707_v26 = vpop.eup %1706 }
 0x92f   :  { %v1709_v28 = vpop.eup %1708  ;;  %v687_v34 = vmul.f32 %v1707_v26, %v683_v32 }
 0x930   :  { %v688_v35 = vmul.f32 %v1709_v28, %v684_v33 }
 0x98f   :  { %v692_v27 = vpop.permute.xlu1 %691 }
 0x990   :  { %v694_v29 = vpop.permute.xlu0 %693  ;;  %v697_v30 = vmul.f32 %v1707_v26, %v692_v27 }
 0x991   :  { %v698_v31 = vmul.f32 %v1709_v28, %v694_v29 }
 0x992   :  { %701 = vrot.lane.b32.xlu1 %v697_v30, %s1837_s3 }
 0x993   :  { %703 = vrot.lane.b32.xlu0 %v698_v31, %s1837_s3 }
 0xa04   :  { %v702_v36 = vpop.permute.xlu1 %701 }
 0xa05   :  { %v704_v37 = vpop.permute.xlu0 %703  ;;  %v707_v38 = vadd.f32 %v702_v36, %v687_v34 }
 0xa06   :  { %v708_v39 = vadd.f32 %v704_v37, %v688_v35 }
 0xa07   :  { %1710 = vtanh.f32 %v707_v38  ;;  %v832_v17 = vrot.slane %v707_v38, 7 }
 0xa08   :  { %1712 = vtanh.f32 %v708_v39  ;;  %v833_v18 = vrot.slane %v708_v39, 7 }
 0xa14   :  { %v1711_v40 = vpop.eup %1710 }
 0xa15   :  { %v1713_v41 = vpop.eup %1712  ;;  %713 = vrot.lane.b32.xlu1 %v1711_v40, %s1836_s16 }
 0xa16   :  { %715 = vrot.lane.b32.xlu0 %v1713_v41, %s1836_s16 }
 0xa87   :  { %v714_v43 = vpop.permute.xlu1 %713 }
 0xa88   :  { %v716_v44 = vpop.permute.xlu0 %715  ;;  %v2028_v46 = vmul.f32 %v1707_v26, %v714_v43 }
 0xa89   :  { %v2030_v47 = vmul.f32 %v1709_v28, %v716_v44 }
 0xa8a   :  { %v732_v48 = vrot.slane %v2028_v46, 3 }
 0xa8b   :  { %v733_v49 = vrot.slane %v2030_v47, 2 }
 0xa8d   :  { %v734_v50 = vsel %vm288_vm2, %v733_v49, %v732_v48 }
 0xa8e   :  { %735 = vrot.lane.b32.xlu1 %v734_v50, %s1837_s3 }
 0xb00   :  { %v736_v51 = vpop.permute.xlu1 %735 }
 0xb01   :  { %1596 = vmatmul.mubr.msk.f32.vlgmr.msra.gmra.mxu1 %vm148_vm3, %v736_v51 }
 0xb02   :  { %1610 = vmatpush3.msra.mxu1 %v1885_v2  ;;  %1617 = vmatprep.mubr.msk.f32.mxu1 %vm1835_vm0, %v1834_v0 }
 0xb03   :  { %1611 = vmatprep.subr.mxu1 %v1834_v0 }
 0xb04   :  { %1612 = vmatpush3.msra.mxu1 %v1891_v4 }
 0xb05   :  { %1613 = vmatprep.subr.mxu1 %v1834_v0 }
 0xb06   :  { %1614 = vmatpush3.msra.mxu1 %v1898_v7 }
 0xb07   :  { %1615 = vmatprep.subr.mxu1 %v1834_v0 }
 0xb08   :  { %1616 = vmatpush3.msra.mxu1 %v1904_v8 }
 0xbc1   :  { %v805_v52 = vpop.f32.mrf.mxu1 }
 0xbc2   :  { %v810_v53 = vrot.slane %v805_v52, 4  ;;  %v811_v54 = vrot.slane %v805_v52, 5 }
 0xbc3   :  { %v1597_v55 = vpop.f32.mrf.mxu1 }
 0xbc4   :  { %v814_v56 = vadd.f32 %v810_v53, %v1937_v15  ;;  %v815_v57 = vadd.f32 %v811_v54, %v1935_v11 }
 0xbc6   :  { %1714 = vtanh.f32 %v814_v56  ;;  %v1472_v60 = vmul.f32 -1.442695, %v814_v56  ;;  %v1473_v63 = vmul.f32 -1.442695, %v815_v57 }
 0xbc7   :  { %1716 = vtanh.f32 %v815_v57 }
 0xbc8   :  { %1718 = vpow2.f32 %v1472_v60 }
 0xbc9   :  { %1720 = vpow2.f32 %v1473_v63 }
 0xbd3   :  { %v1715_v58 = vpop.eup %1714 }
 0xbd4   :  { %v1717_v59 = vpop.eup %1716  ;;  %840 = vrot.lane.b32.xlu0 %v1715_v58, %s1836_s16 }
 0xbd5   :  { %842 = vrot.lane.b32.xlu1 %v1717_v59, %s1836_s16  ;;  %v1719_v1 = vpop.eup %1718 }
 0xbd6   :  { %v1721_v3 = vpop.eup %1720  ;;  %v822_v5 = vadd.f32 1.0, %v1719_v1 }
 0xbd7   :  { %v823_v6 = vadd.f32 1.0, %v1721_v3 }
 0xbd8   :  { %1722 = vrcp.f32 %v822_v5 }
 0xbd9   :  { %1724 = vrcp.f32 %v823_v6 }
 0xbe5   :  { %v1723_v9 = vpop.eup %1722 }
 0xbe6   :  { %v1725_v12 = vpop.eup %1724  ;;  %v836_v19 = vmul.f32 %v1723_v9, %v832_v17 }
 0xbe7   :  { %v837_v20 = vmul.f32 %v1725_v12, %v833_v18 }
 0xc46   :  { %v841_v10 = vpop.permute.xlu0 %840 }
 0xc47   :  { %v843_v13 = vpop.permute.xlu1 %842  ;;  %v846_v14 = vmul.f32 %v1723_v9, %v841_v10 }
 0xc48   :  { %v847_v16 = vmul.f32 %v1725_v12, %v843_v13 }
 0xc49   :  { %850 = vrot.lane.b32.xlu0 %v846_v14, %s1837_s3 }
 0xc4a   :  { %852 = vrot.lane.b32.xlu1 %v847_v16, %s1837_s3 }
 0xcbb   :  { %v851_v21 = vpop.permute.xlu0 %850 }
 0xcbc   :  { %v853_v24 = vpop.permute.xlu1 %852  ;;  %v856_v25 = vadd.f32 %v851_v21, %v836_v19 }
 0xcbd   :  { %v857_v26 = vadd.f32 %v853_v24, %v837_v20 }
 0xcbe   :  { %1726 = vtanh.f32 %v856_v25  ;;  %v981_v56 = vrot.slane %v856_v25, 7 }
 0xcbf   :  { %1728 = vtanh.f32 %v857_v26  ;;  %v982_v57 = vrot.slane %v857_v26, 7 }
 0xccb   :  { %v1727_v27 = vpop.eup %1726 }
 0xccc   :  { %v1729_v28 = vpop.eup %1728  ;;  %862 = vrot.lane.b32.xlu0 %v1727_v27, %s1836_s16 }
 0xccd   :  { %864 = vrot.lane.b32.xlu1 %v1729_v28, %s1836_s16 }
 0xd3e   :  { %v863_v29 = vpop.permute.xlu0 %862 }
 0xd3f   :  { %v865_v30 = vpop.permute.xlu1 %864  ;;  %v2054_v31 = vmul.f32 %v1723_v9, %v863_v29 }
 0xd40   :  { %v2056_v32 = vmul.f32 %v1725_v12, %v865_v30 }
 0xd41   :  { %v881_v33 = vrot.slane %v2054_v31, 4 }
 0xd42   :  { %v882_v34 = vrot.slane %v2056_v32, 3 }
 0xd44   :  { %v883_v35 = vsel %vm288_vm2, %v882_v34, %v881_v33 }
 0xd45   :  { %884 = vrot.lane.b32.xlu0 %v883_v35, %s1837_s3 }
 0xdb7   :  { %v885_v36 = vpop.permute.xlu0 %884 }
 0xdb8   :  { %1607 = vmatmul.mubr.msk.f32.vlgmr.msra.gmra.mxu0 %vm148_vm3, %v885_v36 }
 0xdb9   :  { %1621 = vmatpush3.msra.mxu0 %v1885_v2  ;;  %1628 = vmatprep.mubr.msk.f32.mxu0 %vm1835_vm0, %v1834_v0 }
 0xdba   :  { %1622 = vmatprep.subr.mxu0 %v1834_v0 }
 0xdbb   :  { %1623 = vmatpush3.msra.mxu0 %v1891_v4 }
 0xdbc   :  { %1624 = vmatprep.subr.mxu0 %v1834_v0 }
 0xdbd   :  { %1625 = vmatpush3.msra.mxu0 %v1898_v7 }
 0xdbe   :  { %1626 = vmatprep.subr.mxu0 %v1834_v0 }
 0xdbf   :  { %1627 = vmatpush3.msra.mxu0 %v1904_v8 }
 0xe78   :  { %v954_v37 = vpop.f32.mrf.mxu0 }
 0xe79   :  { %v959_v38 = vrot.slane %v954_v37, 3  ;;  %v960_v39 = vrot.slane %v954_v37, 4 }
 0xe7a   :  { %v1608_v40 = vpop.f32.mrf.mxu0 }
 0xe7b   :  { %v963_v2 = vadd.f32 %v959_v38, %v1937_v15  ;;  %v964_v41 = vadd.f32 %v960_v39, %v1935_v11 }
 0xe7d   :  { %1730 = vtanh.f32 %v963_v2  ;;  %v1475_v7 = vmul.f32 -1.442695, %v963_v2  ;;  %v1476_v0 = vmul.f32 -1.442695, %v964_v41 }
 0xe7e   :  { %1732 = vtanh.f32 %v964_v41 }
 0xe7f   :  { %1734 = vpow2.f32 %v1475_v7 }
 0xe80   :  { %1736 = vpow2.f32 %v1476_v0 }
 0xe8a   :  { %v1731_v43 = vpop.eup %1730 }
 0xe8b   :  { %v1733_v4 = vpop.eup %1732  ;;  %989 = vrot.lane.b32.xlu1 %v1731_v43, %s1836_s16 }
 0xe8c   :  { %991 = vrot.lane.b32.xlu0 %v1733_v4, %s1836_s16  ;;  %v1735_v8 = vpop.eup %1734 }
 0xe8d   :  { %v1737_v44 = vpop.eup %1736  ;;  %v971_v48 = vadd.f32 1.0, %v1735_v8 }
 0xe8e   :  { %v972_v49 = vadd.f32 1.0, %v1737_v44 }
 0xe8f   :  { %1738 = vrcp.f32 %v971_v48 }
 0xe90   :  { %1740 = vrcp.f32 %v972_v49 }
 0xe9c   :  { %v1739_v50 = vpop.eup %1738 }
 0xe9d   :  { %v1741_v52 = vpop.eup %1740  ;;  %v985_v58 = vmul.f32 %v1739_v50, %v981_v56 }
 0xe9e   :  { %v986_v59 = vmul.f32 %v1741_v52, %v982_v57 }
 0xefd   :  { %v990_v51 = vpop.permute.xlu1 %989 }
 0xefe   :  { %v992_v53 = vpop.permute.xlu0 %991  ;;  %v995_v54 = vmul.f32 %v1739_v50, %v990_v51 }
 0xeff   :  { %v996_v55 = vmul.f32 %v1741_v52, %v992_v53 }
 0xf00   :  { %999 = vrot.lane.b32.xlu1 %v995_v54, %s1837_s3 }
 0xf01   :  { %1001 = vrot.lane.b32.xlu0 %v996_v55, %s1837_s3 }
 0xf72   :  { %v1000_v60 = vpop.permute.xlu1 %999 }
 0xf73   :  { %v1002_v63 = vpop.permute.xlu0 %1001  ;;  %v1005_v1 = vadd.f32 %v1000_v60, %v985_v58 }
 0xf74   :  { %v1006_v3 = vadd.f32 %v1002_v63, %v986_v59 }
 0xf75   :  { %1742 = vtanh.f32 %v1005_v1  ;;  %v1130_v43 = vrot.slane %v1005_v1, 7 }
 0xf76   :  { %1744 = vtanh.f32 %v1006_v3  ;;  %v1131_v4 = vrot.slane %v1006_v3, 7 }
 0xf82   :  { %v1743_v5 = vpop.eup %1742 }
 0xf83   :  { %v1745_v6 = vpop.eup %1744  ;;  %1011 = vrot.lane.b32.xlu1 %v1743_v5, %s1836_s16 }
 0xf84   :  { %1013 = vrot.lane.b32.xlu0 %v1745_v6, %s1836_s16 }
 0xff5   :  { %v1012_v9 = vpop.permute.xlu1 %1011 }
 0xff6   :  { %v1014_v10 = vpop.permute.xlu0 %1013  ;;  %v2080_v12 = vmul.f32 %v1739_v50, %v1012_v9 }
 0xff7   :  { %v2082_v13 = vmul.f32 %v1741_v52, %v1014_v10 }
 0xff8   :  { %v1030_v14 = vrot.slane %v2080_v12, 5 }
 0xff9   :  { %v1031_v16 = vrot.slane %v2082_v13, 4 }
 0xffb   :  { %v1032_v17 = vsel %vm288_vm2, %v1031_v16, %v1030_v14 }
 0xffc   :  { %1033 = vrot.lane.b32.xlu1 %v1032_v17, %s1837_s3 }
0x106e   :  { %v1034_v18 = vpop.permute.xlu1 %1033 }
0x106f   :  { %1618 = vmatmul.mubr.msk.f32.vlgmr.msra.gmra.mxu1 %vm148_vm3, %v1034_v18 }
0x112f   :  { %v1103_v19 = vpop.f32.mrf.mxu1 }
0x1130   :  { %v1108_v20 = vrot.slane %v1103_v19, 2  ;;  %v1109_v21 = vrot.slane %v1103_v19, 3 }
0x1131   :  { %v1619_v24 = vpop.f32.mrf.mxu1 }
0x1132   :  { %v1112_v25 = vadd.f32 %v1108_v20, %v1937_v15  ;;  %v1113_v26 = vadd.f32 %v1109_v21, %v1935_v11 }
0x1134   :  { %1746 = vtanh.f32 %v1112_v25  ;;  %v1478_v29 = vmul.f32 -1.442695, %v1112_v25  ;;  %v1479_v30 = vmul.f32 -1.442695, %v1113_v26 }
0x1135   :  { %1748 = vtanh.f32 %v1113_v26 }
0x1136   :  { %1750 = vpow2.f32 %v1478_v29 }
0x1137   :  { %1752 = vpow2.f32 %v1479_v30 }
0x1141   :  { %v1747_v27 = vpop.eup %1746 }
0x1142   :  { %v1749_v28 = vpop.eup %1748  ;;  %1138 = vrot.lane.b32.xlu0 %v1747_v27, %s1836_s16 }
0x1143   :  { %1140 = vrot.lane.b32.xlu1 %v1749_v28, %s1836_s16  ;;  %v1751_v33 = vpop.eup %1750 }
0x1144   :  { %v1753_v34 = vpop.eup %1752  ;;  %v1120_v35 = vadd.f32 1.0, %v1751_v33 }
0x1145   :  { %v1121_v36 = vadd.f32 1.0, %v1753_v34 }
0x1146   :  { %1754 = vrcp.f32 %v1120_v35 }
0x1147   :  { %1756 = vrcp.f32 %v1121_v36 }
0x1153   :  { %v1755_v37 = vpop.eup %1754 }
0x1154   :  { %v1757_v39 = vpop.eup %1756  ;;  %v1134_v7 = vmul.f32 %v1755_v37, %v1130_v43 }
0x1155   :  { %v1135_v0 = vmul.f32 %v1757_v39, %v1131_v4 }
0x11b4   :  { %v1139_v38 = vpop.permute.xlu0 %1138 }
0x11b5   :  { %v1141_v40 = vpop.permute.xlu1 %1140  ;;  %v1144_v2 = vmul.f32 %v1755_v37, %v1139_v38 }
0x11b6   :  { %v1145_v41 = vmul.f32 %v1757_v39, %v1141_v40 }
0x11b7   :  { %1148 = vrot.lane.b32.xlu0 %v1144_v2, %s1837_s3 }
0x11b8   :  { %1150 = vrot.lane.b32.xlu1 %v1145_v41, %s1837_s3 }
0x1229   :  { %v1149_v8 = vpop.permute.xlu0 %1148 }
0x122a   :  { %v1151_v44 = vpop.permute.xlu1 %1150  ;;  %v1154_v48 = vadd.f32 %v1149_v8, %v1134_v7 }
0x122b   :  { %v1155_v49 = vadd.f32 %v1151_v44, %v1135_v0 }
0x122c   :  { %1758 = vtanh.f32 %v1154_v48  ;;  %v1279_v27 = vrot.slane %v1154_v48, 7 }
0x122d   :  { %1760 = vtanh.f32 %v1155_v49  ;;  %v1280_v28 = vrot.slane %v1155_v49, 7 }
0x1239   :  { %v1759_v50 = vpop.eup %1758 }
0x123a   :  { %v1761_v51 = vpop.eup %1760  ;;  %1160 = vrot.lane.b32.xlu0 %v1759_v50, %s1836_s16 }
0x123b   :  { %1162 = vrot.lane.b32.xlu1 %v1761_v51, %s1836_s16 }
0x12ac   :  { %v1161_v52 = vpop.permute.xlu0 %1160 }
0x12ad   :  { %v1163_v53 = vpop.permute.xlu1 %1162  ;;  %v1166_v54 = vmul.f32 %v1755_v37, %v1161_v52  ;;  %v1483_v52 = vld [vmem:[%s2188_s5] ss:$0 sm:$0xff] }
0x12ae   :  { %v2097_v55 = vmul.f32 %v1757_v39, %v1163_v53 }
0x12af   :  { %v1179_v56 = vrot.slane %v1166_v54, 6 }
0x12b0   :  { %v1180_v57 = vrot.slane %v2097_v55, 5 }
0x12b2   :  { %v1181_v58 = vsel %vm288_vm2, %v1180_v57, %v1179_v56 }
0x12b3   :  { %1182 = vrot.lane.b32.xlu0 %v1181_v58, %s1837_s3 }
0x1325   :  { %v1183_v59 = vpop.permute.xlu0 %1182 }
0x1326   :  { %1629 = vmatmul.mubr.msk.f32.vlgmr.msra.gmra.mxu0 %vm148_vm3, %v1183_v59 }
0x13e6   :  { %v1252_v60 = vpop.f32.mrf.mxu0 }
0x13e7   :  { %v1257_v63 = vrot.slane %v1252_v60, 1  ;;  %v1258_v1 = vrot.slane %v1252_v60, 2 }
0x13e8   :  { %v1630_v3 = vpop.f32.mrf.mxu0 }
0x13e9   :  { %v1261_v5 = vadd.f32 %v1257_v63, %v1937_v15  ;;  %v1262_v6 = vadd.f32 %v1258_v1, %v1935_v11 }
0x13eb   :  { %1762 = vtanh.f32 %v1261_v5  ;;  %v1481_v14 = vmul.f32 -1.442695, %v1261_v5  ;;  %v1482_v16 = vmul.f32 -1.442695, %v1262_v6 }
0x13ec   :  { %1764 = vtanh.f32 %v1262_v6 }
0x13ed   :  { %1766 = vpow2.f32 %v1481_v14 }
0x13ee   :  { %1768 = vpow2.f32 %v1482_v16 }
0x13f8   :  { %v1763_v9 = vpop.eup %1762 }
0x13f9   :  { %v1765_v10 = vpop.eup %1764  ;;  %1287 = vrot.lane.b32.xlu1 %v1763_v9, %s1836_s16 }
0x13fa   :  { %1289 = vrot.lane.b32.xlu0 %v1765_v10, %s1836_s16  ;;  %v1767_v17 = vpop.eup %1766 }
0x13fb   :  { %v1769_v18 = vpop.eup %1768  ;;  %v1269_v19 = vadd.f32 1.0, %v1767_v17 }
0x13fc   :  { %v1270_v20 = vadd.f32 1.0, %v1769_v18 }
0x13fd   :  { %1770 = vrcp.f32 %v1269_v19 }
0x13fe   :  { %1772 = vrcp.f32 %v1270_v20 }
0x140a   :  { %v1771_v15 = vpop.eup %1770 }
0x140b   :  { %v1773_v21 = vpop.eup %1772  ;;  %v1283_v29 = vmul.f32 %v1771_v15, %v1279_v27 }
0x140c   :  { %v1284_v30 = vmul.f32 %v1773_v21, %v1280_v28 }
0x146b   :  { %v1288_v11 = vpop.permute.xlu1 %1287 }
0x146c   :  { %v1290_v24 = vpop.permute.xlu0 %1289  ;;  %v1293_v25 = vmul.f32 %v1771_v15, %v1288_v11 }
0x146d   :  { %v1294_v26 = vmul.f32 %v1773_v21, %v1290_v24 }
0x146e   :  { %1297 = vrot.lane.b32.xlu1 %v1293_v25, %s1837_s3 }
0x146f   :  { %1299 = vrot.lane.b32.xlu0 %v1294_v26, %s1837_s3 }
0x14e0   :  { %v1298_v33 = vpop.permute.xlu1 %1297 }
0x14e1   :  { %v1300_v34 = vpop.permute.xlu0 %1299  ;;  %v1303_v35 = vadd.f32 %v1298_v33, %v1283_v29 }
0x14e2   :  { %v1304_v36 = vadd.f32 %v1300_v34, %v1284_v30 }
0x14e3   :  { %1774 = vtanh.f32 %v1303_v35 }
0x14e4   :  { %1776 = vtanh.f32 %v1304_v36 }
0x14f0   :  { %v1775_v37 = vpop.eup %1774 }
0x14f1   :  { %v1777_v38 = vpop.eup %1776  ;;  %1309 = vrot.lane.b32.xlu1 %v1775_v37, %s1836_s16 }
0x14f2   :  { %1311 = vrot.lane.b32.xlu0 %v1777_v38, %s1836_s16 }
0x14f5   :  { %278 = vrot.lane.b32.xlu1 %v1950_v45, %s1837_s3  ;;  %v1333_v45 = vld [vmem:[%s2187_s4 + $0x18] sm:$0xff] }
0x14f6   :  { %426 = vrot.lane.b32.xlu0 %v1974_v22, %s1837_s3  ;;  %1631 = vmatprep.subr.mxu1 %v1333_v45  ;;  %v1331_v22 = vld [vmem:[%s2187_s4 + $0x8] sm:$0xff] }
0x14f7   :  { %1632 = vmatpush3.msra.mxu1 %v1333_v45 }
0x14f9   :  { %574 = vrot.lane.b32.xlu1 %v2001_v61, %s1837_s3 }
0x14fa   :  { %723 = vrot.lane.b32.xlu0 %v2028_v46, %s1837_s3 }
0x14fd   :  { %872 = vrot.lane.b32.xlu1 %v2054_v31, %s1837_s3 }
0x14fe   :  { %1021 = vrot.lane.b32.xlu0 %v2080_v12, %s1837_s3 }
0x1501   :  { %1170 = vrot.lane.b32.xlu1 %v1166_v54, %s1837_s3 }
0x1502   :  { %428 = vrot.lane.b32.xlu0 %v1976_v23, %s1837_s3  ;;  %v1330_v23 = vld [vmem:[%s2187_s4] sm:$0xff] }
0x1505   :  { %280 = vrot.lane.b32.xlu1 %v1947_v42, %s1837_s3  ;;  %v1332_v42 = vld [vmem:[%s2187_s4 + $0x10] sm:$0xff] }
0x1506   :  { %725 = vrot.lane.b32.xlu0 %v2030_v47, %s1837_s3  ;;  %1633 = vmatprep.subr.mxu1 %v1332_v42 }
0x1507   :  { %1634 = vmatpush3.msra.mxu1 %v1332_v42 }
0x1508   :  { %1635 = vmatprep.subr.mxu1 %v1331_v22 }
0x1509   :  { %576 = vrot.lane.b32.xlu1 %v2003_v62, %s1837_s3  ;;  %1636 = vmatpush3.msra.mxu1 %v1331_v22 }
0x150a   :  { %1023 = vrot.lane.b32.xlu0 %v2082_v13, %s1837_s3  ;;  %1637 = vmatprep.subr.mxu1 %v1330_v23 }
0x150b   :  { %1638 = vmatpush3.msra.mxu1 %v1330_v23 }
0x150d   :  { %874 = vrot.lane.b32.xlu1 %v2056_v32, %s1837_s3 }
0x1511   :  { %1172 = vrot.lane.b32.xlu1 %v2097_v55, %s1837_s3 }
0x1563   :  { %v1310_v61 = vpop.permute.xlu1 %1309 }
0x1564   :  { %v1312_v62 = vpop.permute.xlu0 %1311  ;;  %v1315_v46 = vmul.f32 %v1771_v15, %v1310_v61 }
0x1565   :  { %v1316_v31 = vmul.f32 %v1773_v21, %v1312_v62 }
0x1566   :  { %1319 = vrot.lane.b32.xlu0 %v1315_v46, %s1837_s3 }
0x1567   :  { %v279_v47 = vpop.permute.xlu1 %278 }
0x1568   :  { %v427_v32 = vpop.permute.xlu0 %426  ;;  %285 = vst.msk [vmem:[#allocation2] sm:$0x1] %vm284_vm4, %v279_v47 }
0x1569   :  { %433 = vst.msk [vmem:[#allocation2] sm:$0x2] %vm432_vm5, %v427_v32 }
0x156a   :  { %1321 = vrot.lane.b32.xlu0 %v1316_v31, %s1837_s3 }
0x156b   :  { %v575_v12 = vpop.permute.xlu1 %574 }
0x156c   :  { %v724_v13 = vpop.permute.xlu0 %723  ;;  %581 = vst.msk [vmem:[#allocation2] sm:$0x4] %vm580_vm6, %v575_v12 }
0x156d   :  { %730 = vst.msk [vmem:[#allocation2] sm:$0x8] %vm729_vm7, %v724_v13 }
0x156f   :  { %v873_v39 = vpop.permute.xlu1 %872 }
0x1570   :  { %v1022_v40 = vpop.permute.xlu0 %1021  ;;  %879 = vst.msk [vmem:[#allocation2] sm:$0x10] %vm878_vm8, %v873_v39 }
0x1571   :  { %1028 = vst.msk [vmem:[#allocation2] sm:$0x20] %vm1027_vm9, %v1022_v40 }
0x1573   :  { %v1171_v2 = vpop.permute.xlu1 %1170 }
0x1574   :  { %v429_v41 = vpop.permute.xlu0 %428  ;;  %1177 = vst.msk [vmem:[#allocation2] sm:$0x40] %vm1176_vm10, %v1171_v2 }
0x1575   :  { %434 = vst.msk [vmem:[#allocation2 + $0x8] sm:$0x2] %vm432_vm5, %v429_v41 }
0x1577   :  { %v281_v43 = vpop.permute.xlu1 %280 }
0x1578   :  { %v726_v4 = vpop.permute.xlu0 %725  ;;  %286 = vst.msk [vmem:[#allocation2 + $0x8] sm:$0x1] %vm284_vm4, %v281_v43 }
0x1579   :  { %731 = vst.msk [vmem:[#allocation2 + $0x8] sm:$0x8] %vm729_vm7, %v726_v4 }
0x157b   :  { %v577_v7 = vpop.permute.xlu1 %576 }
0x157c   :  { %v1024_v0 = vpop.permute.xlu0 %1023  ;;  %582 = vst.msk [vmem:[#allocation2 + $0x8] sm:$0x4] %vm580_vm6, %v577_v7 }
0x157d   :  { %1029 = vst.msk [vmem:[#allocation2 + $0x8] sm:$0x20] %vm1027_vm9, %v1024_v0 }
0x157f   :  { %v875_v8 = vpop.permute.xlu1 %874 }
0x1580   :  { %880 = vst.msk [vmem:[#allocation2 + $0x8] sm:$0x10] %vm878_vm8, %v875_v8 }
0x1583   :  { %v1173_v44 = vpop.permute.xlu1 %1172 }
0x1584   :  { %1178 = vst.msk [vmem:[#allocation2 + $0x8] sm:$0x40] %vm1176_vm10, %v1173_v44 }
0x15d8   :  { %v1320_v48 = vpop.permute.xlu0 %1319 }
0x15d9   :  { %1326 = vst.msk [vmem:[#allocation2] sm:$0x80] %vm1325_vm11, %v1320_v48 }
0x15dc   :  { %v1322_v49 = vpop.permute.xlu0 %1321 }
0x15dd   :  { %1327 = vst.msk [vmem:[#allocation2 + $0x8] sm:$0x80] %vm1325_vm11, %v1322_v49 }
0x15e0   :  { %v1328_v50 = vld [vmem:[#allocation2] sm:$0xff] }
0x15e1   :  { %1639 = vmatprep.mubr.msk.f32.mxu1 %vm148_vm3, %v1328_v50 }
0x15e4   :  { %v1329_v51 = vld [vmem:[#allocation2 + $0x8] sm:$0xff] }
0x15e5   :  { %1640 = vmatmul.mubr.msk.f32.vlgmr.msra.gmra.mxu1 %vm148_vm3, %v1329_v51 }
0x16a5   :  { %v1641_v53 = vpop.f32.mrf.mxu1 }
0x16a6   :  { %v1419_v54 = vadd.f32 %v1641_v53, %v1483_v52 }
0x16a7   :  { %v1413_v55 = vpop.f32.mrf.mxu1 }
0x16a8   :  { %v1414_v56 = vadd.f32 %v1483_v52, %v1413_v55  ;;  %v1426_v57 = vsel %vm1422_vm12, %v1419_v54, -inf }
0x16a9   :  { %1427 = vmax.xlane.f32.xlu0 %v1426_v57 }
0x16aa   :  { %v1423_v58 = vsel %vm1422_vm12, %v1414_v56, -inf }
0x16ab   :  { %1424 = vmax.xlane.f32.xlu1 %v1423_v58 }
0x1732   :  { %v1428_v59 = vpop.xlane.xlu0 %1427 }
0x1733   :  { %v1430_v60 = vsub.f32 %v1419_v54, %v1428_v59 }
0x1734   :  { %v1425_v63 = vpop.xlane.xlu1 %1424 }
0x1735   :  { %v1433_v1 = vmul.f32 1.442695, %v1430_v60  ;;  %v1429_v3 = vsub.f32 %v1414_v56, %v1425_v63 }
0x1737   :  { %1778 = vpow2.f32 %v1433_v1  ;;  %v1431_v5 = vmul.f32 1.442695, %v1429_v3 }
0x1739   :  { %1780 = vpow2.f32 %v1431_v5 }
0x1744   :  { %v1779_v6 = vpop.eup %1778 }
0x1745   :  { %v1438_v9 = vsel %vm1422_vm12, %v1779_v6, 0.0 }
0x1746   :  { %v1781_v10 = vpop.eup %1780  ;;  %1439 = vadd.xlane.f32.xlu1 %v1438_v9 }
0x1747   :  { %v1435_v14 = vsel %vm1422_vm12, %v1781_v10, 0.0 }
0x1748   :  { %1436 = vadd.xlane.f32.xlu0 %v1435_v14 }
0x17cf   :  { %v1440_v16 = vpop.xlane.xlu1 %1439 }
0x17d0   :  { %1782 = vlog2.f32 %v1440_v16 }
0x17d1   :  { %v1437_v17 = vpop.xlane.xlu0 %1436 }
0x17d2   :  { %1784 = vlog2.f32 %v1437_v17 }
0x17dd   :  { %v1783_v18 = vpop.eup %1782 }
0x17de   :  { %v1444_v19 = vmul.f32 0.6931472, %v1783_v18 }
0x17df   :  { %v1785_v20 = vpop.eup %1784 }
0x17e0   :  { %v1446_v15 = vadd.f32 %v1444_v19, %v1428_v59  ;;  %v1442_v11 = vmul.f32 0.6931472, %v1785_v20 }
0x17e2   :  { %v1448_v21 = vsub.f32 %v1419_v54, %v1446_v15  ;;  %v1445_v24 = vadd.f32 %v1442_v11, %v1425_v63 }
0x17e4   :  { %1450 = vst.msk [vmem:[%s2189_s6 + $0x8] sm:$0xff] %vm1422_vm12, %v1448_v21  ;;  %v1447_v25 = vsub.f32 %v1414_v56, %v1445_v24 }
0x17e6   :  { %1449 = vst.msk [vmem:[%s2189_s6] sm:$0xff] %vm1422_vm12, %v1447_v25 }
0x17e7   :  { %1455 = vsyncpa [#allocation4], 1 }
0x17e8   :  { %1456 = vsyncpa [#allocation6], 1 }

</bundles_post_ra>
